<compile_context>
chip_gen: v5e
topology: v5e:2x2
jax: 0.10.0
libtpu: 0.0.40
codegen_flags: <defaults>
</compile_context>

<pallas_src>
import functools
import math

import jax
import jax.numpy as jnp
from jax.experimental import pallas as pl
from jax.experimental.pallas import tpu as pltpu


def _round_up(a, b):
    return ((a + b - 1) // b) * b


def _gru_cell_kernel(x_ref, h_ref,
                     w_exp_ref, b_exp_ref,
                     w_rz_ref, b_rz_ref,
                     w_in_ref, b_in_ref,
                     w_hn_ref, b_hn_ref,
                     w_y_ref,
                     y_ref, h_new_ref):
    """expand_input -> GRU cell (fused r/z matmul) -> output projection."""
    kp = h_ref.shape[-1]                      # padded k_state (multiple of 128)

    x = x_ref[...]                            # (BT, Ip) f32
    h = h_ref[...]                            # (BT, Kp) f32
    h_bf = h.astype(jnp.bfloat16)

    # expand_input: tanh(x @ W_exp + b_exp), f32 accumulate / f32 tanh
    xe = jnp.tanh(
        jnp.dot(x.astype(jnp.bfloat16), w_exp_ref[...],
                preferred_element_type=jnp.float32)
        + b_exp_ref[...]
    )
    xe_bf = xe.astype(jnp.bfloat16)

    # Fused r/z gates: [xe, h] @ [[W_ih_rz], [W_hh_rz]] + (b_ih_rz + b_hh_rz).
    # Column blocks [0:Kp] = r, [Kp:2Kp] = z -> lane-aligned slices.
    xh = jnp.concatenate([xe_bf, h_bf], axis=-1)            # (BT, 2*Kp) bf16
    g_rz = (jnp.dot(xh, w_rz_ref[...], preferred_element_type=jnp.float32)
            + b_rz_ref[...])
    r = jax.nn.sigmoid(g_rz[:, :kp])
    z = jax.nn.sigmoid(g_rz[:, kp:])

    # n gate: hidden contribution kept separate (needed inside r * gh_n).
    gi_n = (jnp.dot(xe_bf, w_in_ref[...], preferred_element_type=jnp.float32)
            + b_in_ref[...])
    gh_n = (jnp.dot(h_bf, w_hn_ref[...], preferred_element_type=jnp.float32)
            + b_hn_ref[...])
    n = jnp.tanh(gi_n + r * gh_n)

    h_new = (1.0 - z) * n + z * h

    # TODO(synk): Dropout is identity in eval mode / p=0.0, so it is omitted.

    # Output projection (no bias), lane-dense padded output.
    y = jnp.dot(h_new.astype(jnp.bfloat16), w_y_ref[...],
                preferred_element_type=jnp.float32)

    y_ref[...] = y.astype(y_ref.dtype)
    h_new_ref[...] = h_new.astype(h_new_ref.dtype)


@functools.partial(jax.jit, static_argnames=("k_state", "k_out"))
def gru_cell_forward(x, state, pp, *, k_state, k_out):
    """Fused GRUCell forward.

    x:     (B, k_in)    float32
    state: (B, k_state) float32
    pp:    padded/fused params from prepare_padded_params()
    Returns (y_new (B, k_out), state_new (B, k_state)).
    """
    B = x.shape[0]
    Ip = pp["w_exp"].shape[0]
    Kp = pp["w_exp"].shape[1]
    Op = pp["w_y"].shape[1]

    # Batch tiling: one tile for small B, 256-row tiles (MXU-friendly) for big B.
    BT = 256 if B >= 256 else _round_up(B, 8)
    Bp = _round_up(B, BT)
    grid = (Bp // BT,)

    # Zero-pad activations to padded/lane-dense shapes.
    x_p = jnp.zeros((Bp, Ip), jnp.float32).at[:B, :x.shape[1]].set(x)
    h_p = jnp.zeros((Bp, Kp), jnp.float32).at[:B, :k_state].set(state)

    row_spec = lambda cols: pl.BlockSpec((BT, cols), lambda i: (i, 0))
    const_spec = lambda r, c: pl.BlockSpec((r, c), lambda i: (0, 0))

    y_p, h_new_p = pl.pallas_call(
        _gru_cell_kernel,
        out_shape=(
            jax.ShapeDtypeStruct((Bp, Op), jnp.float32),
            jax.ShapeDtypeStruct((Bp, Kp), jnp.float32),
        ),
        grid=grid,
        in_specs=[
            row_spec(Ip),                 # x
            row_spec(Kp),                 # state
            const_spec(Ip, Kp),           # w_exp
            const_spec(1, Kp),            # b_exp
            const_spec(2 * Kp, 2 * Kp),   # w_rz (fused r/z)
            const_spec(1, 2 * Kp),        # b_rz (b_ih + b_hh, r/z)
            const_spec(Kp, Kp),           # w_in (n gate, input side)
            const_spec(1, Kp),            # b_in
            const_spec(Kp, Kp),           # w_hn (n gate, hidden side)
            const_spec(1, Kp),            # b_hn
            const_spec(Kp, Op),           # w_y
        ],
        out_specs=(
            row_spec(Op),                 # y
            row_spec(Kp),                 # h_new
        ),
        input_output_aliases={1: 1},      # state updated in place
        compiler_params=pltpu.CompilerParams(
            dimension_semantics=("parallel",),
            vmem_limit_bytes=64 * 1024 * 1024,
        ),
    )(x_p, h_p,
      pp["w_exp"], pp["b_exp"],
      pp["w_rz"], pp["b_rz"],
      pp["w_in"], pp["b_in"],
      pp["w_hn"], pp["b_hn"],
      pp["w_y"])

    return y_p[:B, :k_out], h_new_p[:B, :k_state]


def init_params(key, k_in, k_state, k_out):
    """Deterministic init mirroring GRUCell.init_params(): U(-stdv, stdv).

    Stored pre-transposed (in_features, out_features); gate columns are
    [r | z | n] to match nn.GRUCell.
    """
    stdv = 1.0 / math.sqrt(k_state)
    keys = jax.random.split(key, 7)

    def u(k, shape):
        return jax.random.uniform(k, shape, jnp.float32, -stdv, stdv)

    return {
        "w_exp": u(keys[0], (k_in, k_state)),
        "b_exp": u(keys[1], (1, k_state)),
        "w_ih": u(keys[2], (k_state, 3 * k_state)),
        "b_ih": u(keys[3], (1, 3 * k_state)),
        "w_hh": u(keys[4], (k_state, 3 * k_state)),
        "b_hh": u(keys[5], (1, 3 * k_state)),
        "w_y": u(keys[6], (k_state, k_out)),
    }


def prepare_padded_params(params, k_in, k_state, k_out):
    """Pad feature dims to multiples of 128, fuse the r/z weights/biases,
    and cast weights to bf16 (biases stay f32)."""
    K = k_state
    Kp = _round_up(k_state, 128)
    Ip = _round_up(k_in, 128)
    Op = _round_up(k_out, 128)

    def pad2(a, rows, cols):
        out = jnp.zeros((rows, cols), jnp.float32)
        return out.at[: a.shape[0], : a.shape[1]].set(a)

    w_ih = params["w_ih"]            # (K, 3K), columns [r | z | n]
    w_hh = params["w_hh"]
    b_ih = params["b_ih"][0]         # (3K,)
    b_hh = params["b_hh"][0]

    w_exp = pad2(params["w_exp"], Ip, Kp)
    b_exp = pad2(params["b_exp"], 1, Kp)

    # Fused r/z weight: rows [xe (Kp) | h (Kp)], cols [r (Kp) | z (Kp)].
    w_rz = jnp.zeros((2 * Kp, 2 * Kp), jnp.float32)
    w_rz = w_rz.at[:K, :K].set(w_ih[:, 0:K])                 # xe -> r
    w_rz = w_rz.at[:K, Kp:Kp + K].set(w_ih[:, K:2 * K])      # xe -> z
    w_rz = w_rz.at[Kp:Kp + K, :K].set(w_hh[:, 0:K])          # h  -> r
    w_rz = w_rz.at[Kp:Kp + K, Kp:Kp + K].set(w_hh[:, K:2 * K])  # h -> z

    b_rz = jnp.zeros((1, 2 * Kp), jnp.float32)
    b_rz = b_rz.at[0, :K].set(b_ih[0:K] + b_hh[0:K])
    b_rz = b_rz.at[0, Kp:Kp + K].set(b_ih[K:2 * K] + b_hh[K:2 * K])

    w_in = pad2(w_ih[:, 2 * K:3 * K], Kp, Kp)
    b_in = pad2(params["b_ih"][:, 2 * K:3 * K], 1, Kp)
    w_hn = pad2(w_hh[:, 2 * K:3 * K], Kp, Kp)
    b_hn = pad2(params["b_hh"][:, 2 * K:3 * K], 1, Kp)

    w_y = pad2(params["w_y"], Kp, Op)

    bf = lambda a: a.astype(jnp.bfloat16)
    return {
        "w_exp": bf(w_exp), "b_exp": b_exp,
        "w_rz": bf(w_rz), "b_rz": b_rz,
        "w_in": bf(w_in), "b_in": b_in,
        "w_hn": bf(w_hn), "b_hn": b_hn,
        "w_y": bf(w_y),
    }


def _reference_forward(x, state, params):
    """Pure-JAX f32 reference for validation."""
    xe = jnp.tanh(x @ params["w_exp"] + params["b_exp"])
    gi = xe @ params["w_ih"] + params["b_ih"]
    gh = state @ params["w_hh"] + params["b_hh"]
    gi_r, gi_z, gi_n = jnp.split(gi, 3, axis=1)
    gh_r, gh_z, gh_n = jnp.split(gh, 3, axis=1)
    r = jax.nn.sigmoid(gi_r + gh_r)
    z = jax.nn.sigmoid(gi_z + gh_z)
    n = jnp.tanh(gi_n + r * gh_n)
    h_new = (1.0 - z) * n + z * state
    y = h_new @ params["w_y"]
    return y, h_new


if __name__ == "__main__":
    B, k_in, k_state, k_out = 8, 16, 32, 8

    key = jax.random.PRNGKey(0)
    k_x, k_h, k_p = jax.random.split(key, 3)

    x = jax.random.normal(k_x, (B, k_in), jnp.float32)
    state = jax.random.normal(k_h, (B, k_state), jnp.float32)
    params = init_params(k_p, k_in, k_state, k_out)
    pp = prepare_padded_params(params, k_in, k_state, k_out)

    y_new, state_new = gru_cell_forward(x, state, pp,
                                        k_state=k_state, k_out=k_out)
    jax.block_until_ready((y_new, state_new))

    y_ref, h_ref = _reference_forward(x, state, params)
    # bf16 matmul operands -> loosen tolerance vs. the f32 reference.
    assert jnp.allclose(y_new, y_ref, atol=2e-2, rtol=2e-2), "y mismatch"
    assert jnp.allclose(state_new, h_ref, atol=2e-2, rtol=2e-2), "state mismatch"

    print("KERNEL_OK")
</pallas_src>

<mosaic_0001>
module attributes {stable_mosaic.version = 11 : i64} {
  func.func @_gru_cell_kernel(%arg0: i32, %arg1: memref<8x128xf32, #tpu.memory_space<vmem>>, %arg2: memref<8x128xf32, #tpu.memory_space<vmem>>, %arg3: memref<128x128xbf16, #tpu.memory_space<vmem>>, %arg4: memref<1x128xf32, #tpu.memory_space<vmem>>, %arg5: memref<256x256xbf16, #tpu.memory_space<vmem>>, %arg6: memref<1x256xf32, #tpu.memory_space<vmem>>, %arg7: memref<128x128xbf16, #tpu.memory_space<vmem>>, %arg8: memref<1x128xf32, #tpu.memory_space<vmem>>, %arg9: memref<128x128xbf16, #tpu.memory_space<vmem>>, %arg10: memref<1x128xf32, #tpu.memory_space<vmem>>, %arg11: memref<128x128xbf16, #tpu.memory_space<vmem>>, %arg12: memref<8x128xf32, #tpu.memory_space<vmem>>, %arg13: memref<8x128xf32, #tpu.memory_space<vmem>>) attributes {dimension_semantics = [#tpu.dimension_semantics<parallel>], iteration_bounds = array<i64: 1>, scalar_prefetch = 0 : i64, scratch_operands = 0 : i64, tpu.core_type = #tpu.core_type<tc>, window_params = [{transform_indices = @transform_0, window_bounds = array<i64: 8, 128>}, {transform_indices = @transform_1, window_bounds = array<i64: 8, 128>}, {pipeline_mode = #tpu.pipeline_mode<synchronous>, transform_indices = @transform_2, window_bounds = array<i64: 128, 128>}, {pipeline_mode = #tpu.pipeline_mode<synchronous>, transform_indices = @transform_3, window_bounds = array<i64: 1, 128>}, {pipeline_mode = #tpu.pipeline_mode<synchronous>, transform_indices = @transform_4, window_bounds = array<i64: 256, 256>}, {pipeline_mode = #tpu.pipeline_mode<synchronous>, transform_indices = @transform_5, window_bounds = array<i64: 1, 256>}, {pipeline_mode = #tpu.pipeline_mode<synchronous>, transform_indices = @transform_6, window_bounds = array<i64: 128, 128>}, {pipeline_mode = #tpu.pipeline_mode<synchronous>, transform_indices = @transform_7, window_bounds = array<i64: 1, 128>}, {pipeline_mode = #tpu.pipeline_mode<synchronous>, transform_indices = @transform_8, window_bounds = array<i64: 128, 128>}, {pipeline_mode = #tpu.pipeline_mode<synchronous>, transform_indices = @transform_9, window_bounds = array<i64: 1, 128>}, {pipeline_mode = #tpu.pipeline_mode<synchronous>, transform_indices = @transform_10, window_bounds = array<i64: 128, 128>}, {transform_indices = @transform_11, window_bounds = array<i64: 8, 128>}, {transform_indices = @transform_12, window_bounds = array<i64: 8, 128>}]} {
    %c0 = arith.constant 0 : index
    %c0_0 = arith.constant 0 : index
    %0 = vector.load %arg1[%c0, %c0_0] : memref<8x128xf32, #tpu.memory_space<vmem>>, vector<8x128xf32>
    %c0_1 = arith.constant 0 : index
    %c0_2 = arith.constant 0 : index
    %1 = vector.load %arg2[%c0_1, %c0_2] : memref<8x128xf32, #tpu.memory_space<vmem>>, vector<8x128xf32>
    %2 = arith.truncf %1 : vector<8x128xf32> to vector<8x128xbf16>
    %3 = arith.truncf %0 : vector<8x128xf32> to vector<8x128xbf16>
    %c0_3 = arith.constant 0 : index
    %c0_4 = arith.constant 0 : index
    %4 = vector.load %arg3[%c0_3, %c0_4] : memref<128x128xbf16, #tpu.memory_space<vmem>>, vector<128x128xbf16>
    %cst = arith.constant dense<0.000000e+00> : vector<8x128xf32>
    %5 = tpu.matmul %3, %4, %cst {dimension_numbers = #tpu.dot_dimension_numbers<[1], [0], [0], [1], [0, 0, 1, 1], [], []>} : vector<8x128xbf16>, vector<128x128xbf16>, vector<8x128xf32> -> vector<8x128xf32>
    %c0_5 = arith.constant 0 : index
    %c0_6 = arith.constant 0 : index
    %6 = vector.load %arg4[%c0_5, %c0_6] : memref<1x128xf32, #tpu.memory_space<vmem>>, vector<1x128xf32>
    %7 = vector.broadcast %6 : vector<1x128xf32> to vector<8x128xf32>
    %8 = arith.addf %5, %7 : vector<8x128xf32>
    %9 = math.tanh %8 : vector<8x128xf32>
    %10 = arith.truncf %9 : vector<8x128xf32> to vector<8x128xbf16>
    %11 = tpu.concatenate %10, %2 in 1 : vector<8x128xbf16>, vector<8x128xbf16> -> vector<8x256xbf16>
    %c0_7 = arith.constant 0 : index
    %c0_8 = arith.constant 0 : index
    %12 = vector.load %arg5[%c0_7, %c0_8] : memref<256x256xbf16, #tpu.memory_space<vmem>>, vector<256x256xbf16>
    %cst_9 = arith.constant dense<0.000000e+00> : vector<8x256xf32>
    %13 = tpu.matmul %11, %12, %cst_9 {dimension_numbers = #tpu.dot_dimension_numbers<[1], [0], [0], [1], [0, 0, 1, 1], [], []>} : vector<8x256xbf16>, vector<256x256xbf16>, vector<8x256xf32> -> vector<8x256xf32>
    %c0_10 = arith.constant 0 : index
    %c0_11 = arith.constant 0 : index
    %14 = vector.load %arg6[%c0_10, %c0_11] : memref<1x256xf32, #tpu.memory_space<vmem>>, vector<1x256xf32>
    %15 = vector.broadcast %14 : vector<1x256xf32> to vector<8x256xf32>
    %16 = arith.addf %13, %15 : vector<8x256xf32>
    %17 = vector.extract_strided_slice %16 {offsets = [0, 0], sizes = [8, 128], strides = [1, 1]} : vector<8x256xf32> to vector<8x128xf32>
    %18 = arith.negf %17 : vector<8x128xf32>
    %19 = math.exp %18 : vector<8x128xf32>
    %cst_12 = arith.constant 1.000000e+00 : f32
    %20 = vector.broadcast %cst_12 : f32 to vector<8x128xf32>
    %21 = arith.addf %20, %19 : vector<8x128xf32>
    %22 = arith.divf %20, %21 : vector<8x128xf32>
    %23 = vector.extract_strided_slice %16 {offsets = [0, 128], sizes = [8, 128], strides = [1, 1]} : vector<8x256xf32> to vector<8x128xf32>
    %24 = arith.negf %23 : vector<8x128xf32>
    %25 = math.exp %24 : vector<8x128xf32>
    %cst_13 = arith.constant 1.000000e+00 : f32
    %26 = vector.broadcast %cst_13 : f32 to vector<8x128xf32>
    %27 = arith.addf %26, %25 : vector<8x128xf32>
    %28 = arith.divf %26, %27 : vector<8x128xf32>
    %c0_14 = arith.constant 0 : index
    %c0_15 = arith.constant 0 : index
    %29 = vector.load %arg7[%c0_14, %c0_15] : memref<128x128xbf16, #tpu.memory_space<vmem>>, vector<128x128xbf16>
    %cst_16 = arith.constant dense<0.000000e+00> : vector<8x128xf32>
    %30 = tpu.matmul %10, %29, %cst_16 {dimension_numbers = #tpu.dot_dimension_numbers<[1], [0], [0], [1], [0, 0, 1, 1], [], []>} : vector<8x128xbf16>, vector<128x128xbf16>, vector<8x128xf32> -> vector<8x128xf32>
    %c0_17 = arith.constant 0 : index
    %c0_18 = arith.constant 0 : index
    %31 = vector.load %arg8[%c0_17, %c0_18] : memref<1x128xf32, #tpu.memory_space<vmem>>, vector<1x128xf32>
    %32 = vector.broadcast %31 : vector<1x128xf32> to vector<8x128xf32>
    %33 = arith.addf %30, %32 : vector<8x128xf32>
    %c0_19 = arith.constant 0 : index
    %c0_20 = arith.constant 0 : index
    %34 = vector.load %arg9[%c0_19, %c0_20] : memref<128x128xbf16, #tpu.memory_space<vmem>>, vector<128x128xbf16>
    %cst_21 = arith.constant dense<0.000000e+00> : vector<8x128xf32>
    %35 = tpu.matmul %2, %34, %cst_21 {dimension_numbers = #tpu.dot_dimension_numbers<[1], [0], [0], [1], [0, 0, 1, 1], [], []>} : vector<8x128xbf16>, vector<128x128xbf16>, vector<8x128xf32> -> vector<8x128xf32>
    %c0_22 = arith.constant 0 : index
    %c0_23 = arith.constant 0 : index
    %36 = vector.load %arg10[%c0_22, %c0_23] : memref<1x128xf32, #tpu.memory_space<vmem>>, vector<1x128xf32>
    %37 = vector.broadcast %36 : vector<1x128xf32> to vector<8x128xf32>
    %38 = arith.addf %35, %37 : vector<8x128xf32>
    %39 = arith.mulf %22, %38 : vector<8x128xf32>
    %40 = arith.addf %33, %39 : vector<8x128xf32>
    %41 = math.tanh %40 : vector<8x128xf32>
    %cst_24 = arith.constant 1.000000e+00 : f32
    %42 = vector.broadcast %cst_24 : f32 to vector<8x128xf32>
    %43 = arith.subf %42, %28 : vector<8x128xf32>
    %44 = arith.mulf %43, %41 : vector<8x128xf32>
    %45 = arith.mulf %28, %1 : vector<8x128xf32>
    %46 = arith.addf %44, %45 : vector<8x128xf32>
    %47 = arith.truncf %46 : vector<8x128xf32> to vector<8x128xbf16>
    %c0_25 = arith.constant 0 : index
    %c0_26 = arith.constant 0 : index
    %48 = vector.load %arg11[%c0_25, %c0_26] : memref<128x128xbf16, #tpu.memory_space<vmem>>, vector<128x128xbf16>
    %cst_27 = arith.constant dense<0.000000e+00> : vector<8x128xf32>
    %49 = tpu.matmul %47, %48, %cst_27 {dimension_numbers = #tpu.dot_dimension_numbers<[1], [0], [0], [1], [0, 0, 1, 1], [], []>} : vector<8x128xbf16>, vector<128x128xbf16>, vector<8x128xf32> -> vector<8x128xf32>
    %c0_28 = arith.constant 0 : index
    %c0_29 = arith.constant 0 : index
    %50 = vector.load %arg12[%c0_28, %c0_29] : memref<8x128xf32, #tpu.memory_space<vmem>>, vector<8x128xf32>
    tpu.vector_store %arg12[%c0_28, %c0_29], %49 {strides = array<i32>} : memref<8x128xf32, #tpu.memory_space<vmem>>, vector<8x128xf32>,
    %c0_30 = arith.constant 0 : index
    %c0_31 = arith.constant 0 : index
    %51 = vector.load %arg13[%c0_30, %c0_31] : memref<8x128xf32, #tpu.memory_space<vmem>>, vector<8x128xf32>
    tpu.vector_store %arg13[%c0_30, %c0_31], %46 {strides = array<i32>} : memref<8x128xf32, #tpu.memory_space<vmem>>, vector<8x128xf32>,
    return
  }
  func.func @transform_0(%arg0: i32) -> (i32, i32) {
    %c0_i32 = arith.constant 0 : i32
    %c0_i32_0 = arith.constant 0 : i32
    return %arg0, %c0_i32 : i32, i32
  }
  func.func @transform_1(%arg0: i32) -> (i32, i32) {
    %c0_i32 = arith.constant 0 : i32
    %c0_i32_0 = arith.constant 0 : i32
    return %arg0, %c0_i32 : i32, i32
  }
  func.func @transform_2(%arg0: i32) -> (i32, i32) {
    %c0_i32 = arith.constant 0 : i32
    %c0_i32_0 = arith.constant 0 : i32
    %c0_i32_1 = arith.constant 0 : i32
    return %c0_i32, %c0_i32_0 : i32, i32
  }
  func.func @transform_3(%arg0: i32) -> (i32, i32) {
    %c0_i32 = arith.constant 0 : i32
    %c0_i32_0 = arith.constant 0 : i32
    %c0_i32_1 = arith.constant 0 : i32
    return %c0_i32, %c0_i32_0 : i32, i32
  }
  func.func @transform_4(%arg0: i32) -> (i32, i32) {
    %c0_i32 = arith.constant 0 : i32
    %c0_i32_0 = arith.constant 0 : i32
    %c0_i32_1 = arith.constant 0 : i32
    return %c0_i32, %c0_i32_0 : i32, i32
  }
  func.func @transform_5(%arg0: i32) -> (i32, i32) {
    %c0_i32 = arith.constant 0 : i32
    %c0_i32_0 = arith.constant 0 : i32
    %c0_i32_1 = arith.constant 0 : i32
    return %c0_i32, %c0_i32_0 : i32, i32
  }
  func.func @transform_6(%arg0: i32) -> (i32, i32) {
    %c0_i32 = arith.constant 0 : i32
    %c0_i32_0 = arith.constant 0 : i32
    %c0_i32_1 = arith.constant 0 : i32
    return %c0_i32, %c0_i32_0 : i32, i32
  }
  func.func @transform_7(%arg0: i32) -> (i32, i32) {
    %c0_i32 = arith.constant 0 : i32
    %c0_i32_0 = arith.constant 0 : i32
    %c0_i32_1 = arith.constant 0 : i32
    return %c0_i32, %c0_i32_0 : i32, i32
  }
  func.func @transform_8(%arg0: i32) -> (i32, i32) {
    %c0_i32 = arith.constant 0 : i32
    %c0_i32_0 = arith.constant 0 : i32
    %c0_i32_1 = arith.constant 0 : i32
    return %c0_i32, %c0_i32_0 : i32, i32
  }
  func.func @transform_9(%arg0: i32) -> (i32, i32) {
    %c0_i32 = arith.constant 0 : i32
    %c0_i32_0 = arith.constant 0 : i32
    %c0_i32_1 = arith.constant 0 : i32
    return %c0_i32, %c0_i32_0 : i32, i32
  }
  func.func @transform_10(%arg0: i32) -> (i32, i32) {
    %c0_i32 = arith.constant 0 : i32
    %c0_i32_0 = arith.constant 0 : i32
    %c0_i32_1 = arith.constant 0 : i32
    return %c0_i32, %c0_i32_0 : i32, i32
  }
  func.func @transform_11(%arg0: i32) -> (i32, i32) {
    %c0_i32 = arith.constant 0 : i32
    %c0_i32_0 = arith.constant 0 : i32
    return %arg0, %c0_i32 : i32, i32
  }
  func.func @transform_12(%arg0: i32) -> (i32, i32) {
    %c0_i32 = arith.constant 0 : i32
    %c0_i32_0 = arith.constant 0 : i32
    return %arg0, %c0_i32 : i32, i32
  }
}

</mosaic_0001>

<bundles_post_ra>
// kernel: gru_cell_forward.1
= control target key start
LH: loop header
LB: loop body
LE: loop exit
PB: predicated region body
PF: predicated region fallthrough
CT: control target
= control target key end

     0   :  { %18 = vsyncpa [#allocation3], 0  ;;  %s1384_s0 = inlined_call_operand.vmem [shape: f32[8,128], index: 0, kind: input, shape index: {}]   ;;  %s1385_s1 = inlined_call_operand.vmem [shape: f32[8,128], index: 1, kind: input, shape index: {}, may-alias: {1,12}]   ;;  %s1386_s2 = inlined_call_operand.hbm [shape: bf16[128,128], index: 2, kind: input, shape index: {}]   ;;  %s1387_s3 = inlined_call_operand.vmem [shape: f32[1,128], index: 3, kind: input, shape index: {}]   ;;  %s1388_s4 = inlined_call_operand.hbm [shape: bf16[256,256], index: 4, kind: input, shape index: {}]   ;;  %s1389_s5 = inlined_call_operand.vmem [shape: f32[1,256], index: 5, kind: input, shape index: {}]   ;;  %s1390_s6 = inlined_call_operand.hbm [shape: bf16[128,128], index: 6, kind: input, shape index: {}]   ;;  %s1391_s7 = inlined_call_operand.vmem [shape: f32[1,128], index: 7, kind: input, shape index: {}]   ;;  %s1392_s8 = inlined_call_operand.hbm [shape: bf16[128,128], index: 8, kind: input, shape index: {}]   ;;  %s1393_s9 = inlined_call_operand.vmem [shape: f32[1,128], index: 9, kind: input, shape index: {}]   ;;  %s1394_s10 = inlined_call_operand.hbm [shape: bf16[128,128], index: 10, kind: input, shape index: {}]   ;;  %s1395_s11 = inlined_call_operand.hbm [shape: f32[8,128], index: 11, kind: output, shape index: {0}]   ;;  %s1396_s12 = inlined_call_operand.vmem [shape: f32[8,128], index: 12, kind: output, shape index: {1}, may-alias: {1,12}]  }
   0x1   :  { %19 = vsyncpa [#allocation6], 0 }
   0x2   :  { %20 = vsyncpa [#allocation9], 0  ;;  %s45_s23 = sshll.u32 %s1388_s4, 4  ;;  %s46_s23 = int_to_ptr.hbm [resolvable:$true] %s45_s23 }
   0x3   :  { %21 = vsyncpa [#allocation4], 0  ;;  %s1265_s24 = smov [#allocation5]   ;;  %s1266_s26 = smov 128  }
   0x4   :  { %s47_s25 = sshll.u32 %s1265_s24, 4  ;;  %s1267_s27 = smov 8   ;;  %s48_s25 = int_to_ptr.vmem [resolvable:$true] %s47_s25 }
   0x5   :  { %53 = dma.hbm_to_vmem [thread:$0]  %s46_s23, 4096, %s48_s25, [#allocation6], %s1266_s26, %s1266_s26, %s1267_s27  }
   0x6   :  { %s75_s30 = sshll.u32 %s1392_s8, 4  ;;  %s1268_s13 = smov [#allocation8]   ;;  %s76_s30 = int_to_ptr.hbm [resolvable:$true] %s75_s30 }
   0x7   :  { %s77_s14 = sshll.u32 %s1268_s13, 4  ;;  %s30_s17 = sshll.u32 %s1386_s2, 4  ;;  %s78_s14 = int_to_ptr.vmem [resolvable:$true] %s77_s14  ;;  %s31_s17 = int_to_ptr.hbm [resolvable:$true] %s30_s17 }
   0x8   :  { %s1269_s4 = smov 64   ;;  %s1270_s18 = smov 4  }
   0x9   :  { %83 = dma.hbm_to_vmem [thread:$0]  %s76_s30, 1024, %s78_s14, [#allocation9], %s1269_s4, %s1269_s4, %s1270_s18  }
   0xa   :  { %s60_s21 = sshll.u32 %s1390_s6, 4  ;;  %s1271_s22 = smov [#allocation2]   ;;  %s61_s21 = int_to_ptr.hbm [resolvable:$true] %s60_s21 }
   0xb   :  { %s32_s23 = sshll.u32 %s1271_s22, 4  ;;  %s1272_s8 = smov [#allocation7]   ;;  %s33_s23 = int_to_ptr.vmem [resolvable:$true] %s32_s23 }
   0xc   :  { %38 = dma.hbm_to_vmem [thread:$0]  %s31_s17, 1024, %s33_s23, [#allocation3], %s1269_s4, %s1269_s4, %s1270_s18  }
   0xd   :  { %s62_s24 = sshll.u32 %s1272_s8, 4  ;;  %s90_s2 = sshll.u32 %s1394_s10, 4  ;;  %s63_s24 = int_to_ptr.vmem [resolvable:$true] %s62_s24  ;;  %s91_s2 = int_to_ptr.hbm [resolvable:$true] %s90_s2 }
   0xe   :  { %68 = dma.hbm_to_vmem [thread:$0]  %s61_s21, 1024, %s63_s24, [#allocation6], %s1269_s4, %s1269_s4, %s1270_s18  }
   0xf   :  { %s1273_s27 = smov [#allocation10]  }
  0x10   :  { %s92_s28 = sshll.u32 %s1273_s27, 4  ;;  %s93_s28 = int_to_ptr.vmem [resolvable:$true] %s92_s28 }
  0x11   :  { %98 = dma.hbm_to_vmem [thread:$0]  %s91_s2, 1024, %s93_s28, [#allocation9], %s1269_s4, %s1269_s4, %s1270_s18  }
  0x12   :  { %1257 = dma.done.wait [#allocation3], 1024  }
  0x13   :  { %1258 = vsyncadd [#allocation3], 4294966272 }
  0x14   :  { %1259 = dma.done.wait [#allocation6], 5120  }
  0x15   :  { %1260 = vsyncadd [#allocation6], 4294962176 }
  0x16   :  { %1261 = dma.done.wait [#allocation9], 2048  }
  0x17   :  { %1262 = vsyncadd [#allocation9], 4294965248  ;;  %v1031_v0 = vld [vmem:[#allocation2 + $0x38] sm:$0xff]  ;;  %v1030_v1 = vld [vmem:[#allocation2 + $0x30] sm:$0xff]  ;;  %s1274_s17 = smov [#allocation11]   ;;  %s750_s20 = sshll.u32 %s1395_s11, 4  ;;  %s751_s20 = int_to_ptr.hbm [resolvable:$true] %s750_s20 }
  0x18   :  { %191 = vmatpush.bf16.msra.mxu0 %v1031_v0  ;;  %v856_v2 = vld [vmem:[#allocation5 + $0x70] sm:$0xf]  ;;  %v1047_v3 = vld [vmem:[#allocation5 + $0x74] sm:$0xf0]  ;;  %v848_v7 = vld [vmem:[#allocation5 + $0x60] sm:$0xf] }
  0x19   :  { %v920_v4 = vld [vmem:[#allocation5 + $0xf0] sm:$0xf]  ;;  %v857_v5 = vor.u32 %v1047_v3, %v856_v2  ;;  %v1063_v6 = vld [vmem:[#allocation5 + $0xf4] sm:$0xf0]  ;;  %v1045_v8 = vld [vmem:[#allocation5 + $0x64] sm:$0xf0] }
  0x1a   :  { %v921_v9 = vor.u32 %v1063_v6, %v920_v4  ;;  %v912_v10 = vld [vmem:[#allocation5 + $0xe0] sm:$0xf]  ;;  %v1061_v11 = vld [vmem:[#allocation5 + $0xe4] sm:$0xf0]  ;;  %v849_v13 = vor.u32 %v1045_v8, %v848_v7  ;;  %v840_v15 = vld [vmem:[#allocation5 + $0x50] sm:$0xf] }
  0x1b   :  { %v1029_v12 = vld [vmem:[#allocation2 + $0x28] sm:$0xff]  ;;  %404 = vmatpush.bf16.msra.mxu1 %v857_v5  ;;  %v913_v14 = vor.u32 %v1061_v11, %v912_v10  ;;  %v1043_v16 = vld [vmem:[#allocation5 + $0x54] sm:$0xf0]  ;;  %v904_v17 = vld [vmem:[#allocation5 + $0xd0] sm:$0xf]  ;;  %s748_s4 = sshll.u32 %s1274_s17, 4  ;;  %s749_s4 = int_to_ptr.vmem [resolvable:$true] %s748_s4 }
  0x1c   :  { %192 = vmatpush.bf16.msra.mxu0 %v1030_v1  ;;  %417 = vmatpush.bf16.msra.mxu2 %v921_v9  ;;  %v1059_v18 = vld [vmem:[#allocation5 + $0xd4] sm:$0xf0]  ;;  %v1046_v19 = vld [vmem:[#allocation5 + $0x74] sm:$0xf]  ;;  %v858_v20 = vld [vmem:[#allocation5 + $0x78] sm:$0xf0]  ;;  %v841_v23 = vor.u32 %v1043_v16, %v840_v15 }
  0x1d   :  { %v861_v21 = vor.u32 %v1046_v19, %v858_v20  ;;  %v1028_v22 = vld [vmem:[#allocation2 + $0x20] sm:$0xff]  ;;  %v905_v25 = vor.u32 %v1059_v18, %v904_v17  ;;  %v1041_v26 = vld [vmem:[#allocation5 + $0x44] sm:$0xf0]  ;;  %v850_v28 = vld [vmem:[#allocation5 + $0x68] sm:$0xf0] }
  0x1e   :  { %v832_v24 = vld [vmem:[#allocation5 + $0x40] sm:$0xf]  ;;  %v1044_v27 = vld [vmem:[#allocation5 + $0x64] sm:$0xf]  ;;  %v1057_v30 = vld [vmem:[#allocation5 + $0xc4] sm:$0xf0] }
  0x1f   :  { %405 = vmatpush.bf16.msra.mxu1 %v849_v13  ;;  %430 = vmatpush.bf16.msra.mxu3 %v861_v21  ;;  %v896_v29 = vld [vmem:[#allocation5 + $0xc0] sm:$0xf]  ;;  %v853_v31 = vor.u32 %v1044_v27, %v850_v28  ;;  %v1042_v32 = vld [vmem:[#allocation5 + $0x54] sm:$0xf]  ;;  %v1027_v33 = vld [vmem:[#allocation2 + $0x18] sm:$0xff]  ;;  %v833_v34 = vor.u32 %v1041_v26, %v832_v24 }
  0x20   :  { %193 = vmatpush.bf16.msra.mxu0 %v1029_v12  ;;  %418 = vmatpush.bf16.msra.mxu2 %v913_v14  ;;  %v842_v35 = vld [vmem:[#allocation5 + $0x58] sm:$0xf0]  ;;  %v897_v36 = vor.u32 %v1057_v30, %v896_v29  ;;  %v824_v37 = vld [vmem:[#allocation5 + $0x30] sm:$0xf]  ;;  %v1039_v38 = vld [vmem:[#allocation5 + $0x34] sm:$0xf0] }
  0x21   :  { %v888_v39 = vld [vmem:[#allocation5 + $0xb0] sm:$0xf]  ;;  %v845_v40 = vor.u32 %v1042_v32, %v842_v35  ;;  %v1055_v41 = vld [vmem:[#allocation5 + $0xb4] sm:$0xf0]  ;;  %v1040_v42 = vld [vmem:[#allocation5 + $0x44] sm:$0xf]  ;;  %v825_v45 = vor.u32 %v1039_v38, %v824_v37 }
  0x22   :  { %v834_v43 = vld [vmem:[#allocation5 + $0x48] sm:$0xf0]  ;;  %v1026_v44 = vld [vmem:[#allocation2 + $0x10] sm:$0xff]  ;;  %v816_v46 = vld [vmem:[#allocation5 + $0x20] sm:$0xf]  ;;  %v889_v47 = vor.u32 %v1055_v41, %v888_v39 }
  0x23   :  { %406 = vmatpush.bf16.msra.mxu1 %v841_v23  ;;  %431 = vmatpush.bf16.msra.mxu3 %v853_v31  ;;  %v1037_v48 = vld [vmem:[#allocation5 + $0x24] sm:$0xf0]  ;;  %v880_v49 = vld [vmem:[#allocation5 + $0xa0] sm:$0xf]  ;;  %v837_v51 = vor.u32 %v1040_v42, %v834_v43  ;;  %v1038_v52 = vld [vmem:[#allocation5 + $0x34] sm:$0xf] }
  0x24   :  { %194 = vmatpush.bf16.msra.mxu0 %v1028_v22  ;;  %419 = vmatpush.bf16.msra.mxu2 %v905_v25  ;;  %v1053_v50 = vld [vmem:[#allocation5 + $0xa4] sm:$0xf0]  ;;  %v826_v53 = vld [vmem:[#allocation5 + $0x38] sm:$0xf0]  ;;  %v817_v55 = vor.u32 %v1037_v48, %v816_v46  ;;  %v1062_v56 = vld [vmem:[#allocation5 + $0xf4] sm:$0xf] }
  0x25   :  { %v1025_v54 = vld [vmem:[#allocation2 + $0x8] sm:$0xff]  ;;  %v881_v57 = vor.u32 %v1053_v50, %v880_v49  ;;  %v808_v58 = vld [vmem:[#allocation5 + $0x10] sm:$0xf]  ;;  %v1035_v59 = vld [vmem:[#allocation5 + $0x14] sm:$0xf0]  ;;  %v829_v60 = vor.u32 %v1038_v52, %v826_v53 }
  0x26   :  { %v922_v61 = vld [vmem:[#allocation5 + $0xf8] sm:$0xf0]  ;;  %v872_v62 = vld [vmem:[#allocation5 + $0x90] sm:$0xf]  ;;  %v1051_v63 = vld [vmem:[#allocation5 + $0x94] sm:$0xf0]  ;;  %v809_v2 = vor.u32 %v1035_v59, %v808_v58 }
  0x27   :  { %407 = vmatpush.bf16.msra.mxu1 %v833_v34  ;;  %432 = vmatpush.bf16.msra.mxu3 %v845_v40  ;;  %v1024_v0 = vld [vmem:[#allocation2] sm:$0xff]  ;;  %v925_v3 = vor.u32 %v1062_v56, %v922_v61  ;;  %v873_v5 = vor.u32 %v1051_v63, %v872_v62  ;;  %v1033_v7 = vld [vmem:[#allocation5 + $0x4] sm:$0xf0]  ;;  %v914_v8 = vld [vmem:[#allocation5 + $0xe8] sm:$0xf0] }
  0x28   :  { %195 = vmatpush.bf16.msra.mxu0 %v1027_v33  ;;  %420 = vmatpush.bf16.msra.mxu2 %v897_v36  ;;  %v119_v1 = vld [vmem:[%s1384_s0] sm:$0xff]  ;;  %v1049_v10 = vld [vmem:[#allocation5 + $0x84] sm:$0xf0]  ;;  %v1058_v14 = vld [vmem:[#allocation5 + $0xd4] sm:$0xf] }
  0x29   :  { %v1060_v4 = vld [vmem:[#allocation5 + $0xe4] sm:$0xf]  ;;  %v800_v6 = vld [vmem:[#allocation5] sm:$0xf]  ;;  %v122_v11 = vpack.c.bf16 %v119_v1, %v119_v1  ;;  %v906_v16 = vld [vmem:[#allocation5 + $0xd8] sm:$0xf0] }
  0x2a   :  { %v864_v9 = vld [vmem:[#allocation5 + $0x80] sm:$0xf]  ;;  %v801_v12 = vor.u32 %v1033_v7, %v800_v6  ;;  %v917_v13 = vor.u32 %v1060_v4, %v914_v8  ;;  %v1071_v17 = vld [vmem:[#allocation7 + $0x38] sm:$0xff]  ;;  %v909_v19 = vor.u32 %v1058_v14, %v906_v16  ;;  %v1056_v20 = vld [vmem:[#allocation5 + $0xc4] sm:$0xf] }
  0x2b   :  { %408 = vmatpush.bf16.msra.mxu1 %v825_v45  ;;  %433 = vmatpush.bf16.msra.mxu3 %v837_v51  ;;  %v865_v15 = vor.u32 %v1049_v10, %v864_v9  ;;  %v1079_v18 = vld [vmem:[#allocation8 + $0x38] sm:$0xff]  ;;  %v898_v21 = vld [vmem:[#allocation5 + $0xc8] sm:$0xf0]  ;;  %v1361_v23 = vld [vmem:[%s1385_s1] sm:$0xff] }
  0x2c   :  { %196 = vmatpush.bf16.msra.mxu0 %v1026_v44  ;;  %421 = vmatpush.bf16.msra.mxu2 %v889_v47  ;;  %v901_v22 = vor.u32 %v1056_v20, %v898_v21  ;;  %v1054_v24 = vld [vmem:[#allocation5 + $0xb4] sm:$0xf]  ;;  %v890_v25 = vld [vmem:[#allocation5 + $0xb8] sm:$0xf0]  ;;  %v121_v26 = vpack.c.bf16 %v1361_v23, %v1361_v23  ;;  %v1036_v28 = vld [vmem:[#allocation5 + $0x24] sm:$0xf] }
  0x2d   :  { %v893_v27 = vor.u32 %v1054_v24, %v890_v25  ;;  %v818_v29 = vld [vmem:[#allocation5 + $0x28] sm:$0xf0]  ;;  %v1070_v31 = vld [vmem:[#allocation7 + $0x30] sm:$0xff]  ;;  %v1052_v33 = vld [vmem:[#allocation5 + $0xa4] sm:$0xf] }
  0x2e   :  { %v821_v30 = vor.u32 %v1036_v28, %v818_v29  ;;  %v1078_v32 = vld [vmem:[#allocation8 + $0x30] sm:$0xff]  ;;  %v882_v34 = vld [vmem:[#allocation5 + $0xa8] sm:$0xf0]  ;;  %v810_v37 = vld [vmem:[#allocation5 + $0x18] sm:$0xf0] }
  0x2f   :  { %409 = vmatpush.bf16.msra.mxu1 %v817_v55  ;;  %434 = vmatpush.bf16.msra.mxu3 %v829_v60  ;;  %v885_v35 = vor.u32 %v1052_v33, %v882_v34  ;;  %v1034_v36 = vld [vmem:[#allocation5 + $0x14] sm:$0xf]  ;;  %v1069_v39 = vld [vmem:[#allocation7 + $0x28] sm:$0xff]  ;;  %v874_v42 = vld [vmem:[#allocation5 + $0x98] sm:$0xf0] }
  0x30   :  { %197 = vmatpush.bf16.msra.mxu0 %v1025_v54  ;;  %422 = vmatpush.bf16.msra.mxu2 %v881_v57  ;;  %v813_v38 = vor.u32 %v1034_v36, %v810_v37  ;;  %v1077_v40 = vld [vmem:[#allocation8 + $0x28] sm:$0xff]  ;;  %v1050_v41 = vld [vmem:[#allocation5 + $0x94] sm:$0xf]  ;;  %v1032_v44 = vld [vmem:[#allocation5 + $0x4] sm:$0xf] }
  0x31   :  { %v877_v43 = vor.u32 %v1050_v41, %v874_v42  ;;  %v802_v45 = vld [vmem:[#allocation5 + $0x8] sm:$0xf0]  ;;  %v1068_v47 = vld [vmem:[#allocation7 + $0x20] sm:$0xff]  ;;  %v1067_v52 = vld [vmem:[#allocation7 + $0x18] sm:$0xff] }
  0x32   :  { %v805_v46 = vor.u32 %v1032_v44, %v802_v45  ;;  %v1076_v48 = vld [vmem:[#allocation8 + $0x20] sm:$0xff]  ;;  %v866_v50 = vld [vmem:[#allocation5 + $0x88] sm:$0xf0]  ;;  %v1075_v53 = vld [vmem:[#allocation8 + $0x18] sm:$0xff] }
  0x33   :  { %410 = vmatpush.bf16.msra.mxu1 %v809_v2  ;;  %435 = vmatpush.bf16.msra.mxu3 %v821_v30  ;;  %v1048_v49 = vld [vmem:[#allocation5 + $0x84] sm:$0xf]  ;;  %v1066_v54 = vld [vmem:[#allocation7 + $0x10] sm:$0xff]  ;;  %v1065_v56 = vld [vmem:[#allocation7 + $0x8] sm:$0xff] }
  0x34   :  { %198 = vmatpush.bf16.msra.mxu0 %v1024_v0  ;;  %423 = vmatpush.bf16.msra.mxu2 %v873_v5  ;;  %v869_v51 = vor.u32 %v1048_v49, %v866_v50  ;;  %v1074_v55 = vld [vmem:[#allocation8 + $0x10] sm:$0xff]  ;;  %v1073_v57 = vld [vmem:[#allocation8 + $0x8] sm:$0xff]  ;;  %v1064_v58 = vld [vmem:[#allocation7] sm:$0xff] }
  0x35   :  { %v1072_v59 = vld [vmem:[#allocation8] sm:$0xff]  ;;  %v1087_v6 = vld [vmem:[#allocation10 + $0x38] sm:$0xff]  ;;  %v1086_v7 = vld [vmem:[#allocation10 + $0x30] sm:$0xff] }
  0x36   :  { %v1098_v60 = vld [vmem:[%s1387_s3] ss:$0 sm:$0xff]  ;;  %v1085_v9 = vld [vmem:[#allocation10 + $0x28] sm:$0xff]  ;;  %v1083_v16 = vld [vmem:[#allocation10 + $0x18] sm:$0xff] }
  0x37   :  { %199 = vmatmul.bf16.vlgmr.msra.gmra.mxu0 %v122_v11  ;;  %411 = vmatpush.bf16.msra.mxu1 %v801_v12  ;;  %v238_v10 = vld [vmem:[%s1389_s5] sm:$0x3]  ;;  %v1082_v20 = vld [vmem:[#allocation10 + $0x10] sm:$0xff]  ;;  %v1081_v24 = vld [vmem:[#allocation10 + $0x8] sm:$0xff] }
  0x38   :  { %443 = vmatpush.bf16.msrb.mxu0 %v925_v3  ;;  %424 = vmatpush.bf16.msra.mxu2 %v865_v15  ;;  %v240_v11 = vperm.slane %v238_v10, 0  ;;  %v1084_v12 = vld [vmem:[#allocation10 + $0x20] sm:$0xff] }
  0x39   :  { %436 = vmatpush.bf16.msra.mxu3 %v813_v38  ;;  %v1080_v28 = vld [vmem:[#allocation10] sm:$0xff] }
  0x3a   :  { %v1099_v44 = vld [vmem:[%s1391_s7] ss:$0 sm:$0xff] }
  0x3b   :  { %562 = vmatpush.bf16.msrb.mxu1 %v1071_v17  ;;  %425 = vmatmul.bf16.vlgmr.msra.gmra.mxu2 %v121_v26 }
  0x3c   :  { %444 = vmatpush.bf16.msrb.mxu0 %v917_v13  ;;  %643 = vmatpush.bf16.msrb.mxu2 %v1079_v18  ;;  %v241_v18 = vperm.slane %v238_v10, 1 }
  0x3d   :  { %437 = vmatpush.bf16.msra.mxu3 %v805_v46 }
  0x3f   :  { %563 = vmatpush.bf16.msrb.mxu1 %v1070_v31 }
  0x40   :  { %445 = vmatpush.bf16.msrb.mxu0 %v909_v19  ;;  %644 = vmatpush.bf16.msrb.mxu2 %v1078_v32 }
  0x41   :  { %728 = vmatpush.bf16.msrb.mxu3 %v1087_v6 }
  0x43   :  { %564 = vmatpush.bf16.msrb.mxu1 %v1069_v39  ;;  %v1100_v39 = vld [vmem:[%s1393_s9] ss:$0 sm:$0xff] }
  0x44   :  { %446 = vmatpush.bf16.msrb.mxu0 %v901_v22  ;;  %645 = vmatpush.bf16.msrb.mxu2 %v1077_v40 }
  0x45   :  { %729 = vmatpush.bf16.msrb.mxu3 %v1086_v7 }
  0x47   :  { %565 = vmatpush.bf16.msrb.mxu1 %v1068_v47 }
  0x48   :  { %447 = vmatpush.bf16.msrb.mxu0 %v893_v27  ;;  %646 = vmatpush.bf16.msrb.mxu2 %v1076_v48 }
  0x49   :  { %730 = vmatpush.bf16.msrb.mxu3 %v1085_v9 }
  0x4b   :  { %566 = vmatpush.bf16.msrb.mxu1 %v1067_v52 }
  0x4c   :  { %448 = vmatpush.bf16.msrb.mxu0 %v885_v35  ;;  %647 = vmatpush.bf16.msrb.mxu2 %v1075_v53 }
  0x4d   :  { %731 = vmatpush.bf16.msrb.mxu3 %v1084_v12 }
  0x4f   :  { %567 = vmatpush.bf16.msrb.mxu1 %v1066_v54 }
  0x50   :  { %449 = vmatpush.bf16.msrb.mxu0 %v877_v43  ;;  %648 = vmatpush.bf16.msrb.mxu2 %v1074_v55 }
  0x51   :  { %732 = vmatpush.bf16.msrb.mxu3 %v1083_v16 }
  0x53   :  { %568 = vmatpush.bf16.msrb.mxu1 %v1065_v56 }
  0x54   :  { %450 = vmatpush.bf16.msrb.mxu0 %v869_v51  ;;  %649 = vmatpush.bf16.msrb.mxu2 %v1073_v57 }
  0x55   :  { %733 = vmatpush.bf16.msrb.mxu3 %v1082_v20 }
  0x57   :  { %451 = vmatmul.bf16.vlgmr.msrb.gmra.mxu0 %v121_v26  ;;  %569 = vmatpush.bf16.msrb.mxu1 %v1064_v58 }
  0x58   :  { %650 = vmatpush.bf16.msrb.mxu2 %v1072_v59 }
  0x59   :  { %734 = vmatpush.bf16.msrb.mxu3 %v1081_v24 }
  0x5b   :  { %651 = vmatmul.bf16.vlgmr.msrb.gmra.mxu2 %v121_v26 }
  0x5d   :  { %735 = vmatpush.bf16.msrb.mxu3 %v1080_v28 }
  0xb4   :  { %v200_v61 = vpop.f32.mrf.mxu0 }
  0xb5   :  { %v201_v62 = vadd.f32 %v1098_v60, %v200_v61 }
  0xb7   :  { %1101 = vtanh.f32 %v201_v62 }
  0xbc   :  { %v202_v63 = vpop.f32.mrf.mxu0 }
  0xbd   :  { %v1102_v0 = vpop.eup %1101 }
  0xbe   :  { %v205_v1 = vpack.c.bf16 %v1102_v0, %v1102_v0  ;;  %v426_v2 = vpop.f32.mrf.mxu2 }
  0xc0   :  { %412 = vmatmul.bf16.vlgmr.msra.gmra.mxu1 %v205_v1  ;;  %438 = vmatmul.bf16.vlgmr.msra.gmra.mxu3 %v205_v1 }
  0xc6   :  { %v428_v3 = vpop.f32.mrf.mxu2 }
  0xd0   :  { %570 = vmatmul.bf16.vlgmr.msrb.gmra.mxu1 %v205_v1 }
  0xd4   :  { %v452_v4 = vpop.f32.mrf.mxu0 }
  0xdc   :  { %v454_v5 = vpop.f32.mrf.mxu0 }
  0xde   :  { %v652_v8 = vpop.f32.mrf.mxu2 }
  0xdf   :  { %v653_v47 = vadd.f32 %v1100_v39, %v652_v8 }
  0xe6   :  { %v654_v13 = vpop.f32.mrf.mxu2 }
 0x13d   :  { %v413_v14 = vpop.f32.mrf.mxu1 }
 0x13e   :  { %v414_v15 = vadd.f32 %v413_v14, %v240_v11 }
 0x140   :  { %v427_v17 = vadd.f32 %v426_v2, %v414_v15 }
 0x142   :  { %v926_v19 = vmul.f32 -1.442695, %v427_v17 }
 0x143   :  { %v439_v21 = vpop.f32.mrf.mxu3 }
 0x144   :  { %1103 = vpow2.f32 %v926_v19  ;;  %v440_v22 = vadd.f32 %v439_v21, %v241_v18 }
 0x145   :  { %v415_v25 = vpop.f32.mrf.mxu1 }
 0x146   :  { %v453_v26 = vadd.f32 %v452_v4, %v440_v22 }
 0x148   :  { %v927_v27 = vmul.f32 -1.442695, %v453_v26 }
 0x14a   :  { %v1104_v29 = vpop.eup %1103  ;;  %1105 = vpow2.f32 %v927_v27 }
 0x14b   :  { %v459_v30 = vadd.f32 1.0, %v1104_v29  ;;  %v441_v31 = vpop.f32.mrf.mxu3 }
 0x14d   :  { %1107 = vrcp.f32 %v459_v30  ;;  %v571_v32 = vpop.f32.mrf.mxu1  ;;  %v471_v40 = vand.u32 2147483648, %v459_v30  ;;  %v469_v42 = vand.u32 2147483647, %v459_v30  ;;  %vm465_vm1 = vweird.f32 %v459_v30 }
 0x14e   :  { %v572_v51 = vadd.f32 %v1099_v44, %v571_v32 }
 0x14f   :  { %v472_v48 = vor.u32 1.1754944e-38, %v471_v40  ;;  %vm470_vm3 = vcmp.eq.f32.partialorder %v469_v42, 8.507059e+37 }
 0x150   :  { %v1106_v33 = vpop.eup %1105 }
 0x151   :  { %v478_v34 = vadd.f32 1.0, %v1106_v33 }
 0x153   :  { %v1108_v35 = vpop.eup %1107  ;;  %1109 = vrcp.f32 %v478_v34  ;;  %v490_v55 = vand.u32 2147483648, %v478_v34  ;;  %v488_v56 = vand.u32 2147483647, %v478_v34  ;;  %vm484_vm5 = vweird.f32 %v478_v34 }
 0x154   :  { %v461_v36 = vmul.f32 %v1108_v35, %v459_v30  ;;  %vm466_vm0 = vweird.f32 %v1108_v35 }
 0x155   :  { %v573_v37 = vpop.f32.mrf.mxu1  ;;  %vm467_vm2 = vmor %vm465_vm1, %vm466_vm0  ;;  %v491_v60 = vor.u32 1.1754944e-38, %v490_v55  ;;  %vm489_vm7 = vcmp.eq.f32.partialorder %v488_v56, 8.507059e+37 }
 0x156   :  { %v462_v38 = vsub.f32 1.0, %v461_v36 }
 0x158   :  { %v463_v41 = vmul.f32 %v1108_v35, %v462_v38 }
 0x159   :  { %v1110_v43 = vpop.eup %1109 }
 0x15a   :  { %v480_v45 = vmul.f32 %v1110_v43, %v478_v34  ;;  %v464_v46 = vadd.f32 %v1108_v35, %v463_v41  ;;  %vm485_vm4 = vweird.f32 %v1110_v43 }
 0x15b   :  { %vm486_vm6 = vmor %vm484_vm5, %vm485_vm4 }
 0x15c   :  { %v481_v49 = vsub.f32 1.0, %v480_v45  ;;  %v468_v50 = vsel %vm467_vm2, %v1108_v35, %v464_v46 }
 0x15d   :  { %v473_v52 = vsel %vm470_vm3, %v472_v48, %v468_v50 }
 0x15e   :  { %v656_v53 = vmul.f32 %v653_v47, %v473_v52  ;;  %v482_v54 = vmul.f32 %v1110_v43, %v481_v49 }
 0x160   :  { %v657_v57 = vadd.f32 %v656_v53, %v572_v51  ;;  %v483_v58 = vadd.f32 %v1110_v43, %v482_v54 }
 0x162   :  { %1111 = vtanh.f32 %v657_v57  ;;  %v487_v59 = vsel %vm486_vm6, %v1110_v43, %v483_v58 }
 0x163   :  { %v492_v61 = vsel %vm489_vm7, %v491_v60, %v487_v59 }
 0x164   :  { %v659_v62 = vsub.f32 1.0, %v492_v61  ;;  %v661_v1 = vmul.f32 %v492_v61, %v1361_v23 }
 0x168   :  { %v1112_v63 = vpop.eup %1111 }
 0x169   :  { %v660_v0 = vmul.f32 %v1112_v63, %v659_v62 }
 0x16b   :  { %v662_v2 = vadd.f32 %v661_v1, %v660_v0 }
 0x16d   :  { %v663_v3 = vpack.c.bf16 %v662_v2, %v662_v2  ;;  %742 = vst [vmem:[%s1396_s12] sm:$0xff] %v662_v2 }
 0x16f   :  { %736 = vmatmul.bf16.vlgmr.msrb.gmra.mxu3 %v663_v3 }
 0x1f2   :  { %v737_v4 = vpop.f32.mrf.mxu3 }
 0x1f3   :  { %741 = vst [vmem:[#allocation11] sm:$0xff] %v737_v4 }
 0x1f4   :  { %753 = dma.vmem_to_hbm [thread:$0]  %s749_s4, 128, %s751_s20, [#allocation4]  }
 0x1fa   :  { %v739_v5 = vpop.f32.mrf.mxu3 }
 0x1fb   :  { %1263 = dma.done.wait [#allocation4], 128  }
 0x1fc   :  { %1264 = vsyncadd [#allocation4], 4294967168 }
 0x1fd   :  { %762 = vsyncpa [#allocation3], 1 }
 0x1fe   :  { %763 = vsyncpa [#allocation6], 1 }
 0x1ff   :  { %764 = vsyncpa [#allocation9], 1 }
 0x200   :  { %765 = vsyncpa [#allocation4], 1 }

</bundles_post_ra>
